<compile_context>
chip_gen: v7x
topology: tpu7x:2x2x1
jax: 0.10.0
libtpu: 0.0.40
codegen_flags: <defaults>
</compile_context>

<pallas_src>
import functools

import jax
import jax.numpy as jnp
import numpy as np
from jax.experimental import pallas as pl
from jax.experimental.pallas import tpu as pltpu  # noqa: F401  (kept for TPU-specific tuning hooks)

_LEAKY_SLOPE = 0.01  # PyTorch nn.LeakyReLU default


# ----------------------------------------------------------------------------
# Fused Pallas kernel
# ----------------------------------------------------------------------------
def _fused_kernel(x_ref, label_ref,
                  w_tok_ref, b_tok_ref, p_tok_ref, pb_tok_ref,
                  w_lab_ref, b_lab_ref, p_lab_ref, pb_lab_ref,
                  w_rel_ref,
                  s_raw_ref, tok_fac_ref, lab_fac_ref,
                  *, B, N, H, R, slope, inv_scale):
    """Single-launch fused forward.

    Inputs
      x_ref      : [B*N, D]        token states
      label_ref  : [n_rel, D]      label embedding table
      w_tok_ref  : [D, 11H+2]      [rel_x | 1-col | rel_y | 1-col | 9 penta MLPs]
      b_tok_ref  : [1, 11H+2]
      p_tok_ref  : [9H, 9*rank]    block-diagonal rank projections (token side)
      pb_tok_ref : [1, 9*rank]     absorbed bias-1 rows of those projections
      w_lab_ref  : [D, 6H], b_lab_ref : [1, 6H]
      p_lab_ref  : [6H, 6*rank], pb_lab_ref : [1, 6*rank]
      w_rel_ref  : [R, H+1, H+1]   biaffine tensor (bias rows/cols included)
    Outputs
      s_raw_ref  : [B, R, N, N]    (wrapper transposes to [B, N, N, R])
      tok_fac_ref: [B*N, 9*rank]
      lab_fac_ref: [n_rel, 6*rank]
    """
    E = H + 1
    f32 = jnp.float32

    # ---- all 11 token-side MLPs as one wide matmul -------------------------
    h = jnp.dot(x_ref[...], w_tok_ref[...], preferred_element_type=f32)
    h = h + b_tok_ref[...]
    h = jnp.where(h >= 0.0, h, slope * h)          # LeakyReLU; the 1-columns stay 1

    hx = h[:, :E]                                  # [B*N, H+1]  (rel "x" MLP + bias-1)
    hy = h[:, E:2 * E]                             # [B*N, H+1]  (rel "y" MLP + bias-1)
    h_pen = h[:, 2 * E:]                           # [B*N, 9H]   (penta factor MLPs)

    # ---- 9 penta token factors: one block-diagonal projection --------------
    tok_fac_ref[...] = (jnp.dot(h_pen, p_tok_ref[...], preferred_element_type=f32)
                        + pb_tok_ref[...])

    # ---- 6 label-side MLPs + projections ------------------------------------
    hl = jnp.dot(label_ref[...], w_lab_ref[...], preferred_element_type=f32)
    hl = hl + b_lab_ref[...]
    hl = jnp.where(hl >= 0.0, hl, slope * hl)
    lab_fac_ref[...] = (jnp.dot(hl, p_lab_ref[...], preferred_element_type=f32)
                        + pb_lab_ref[...])

    # ---- biaffine rel scores with fused scaling + label-0 masking ----------
    w = w_rel_ref[...]                                         # [R, E, E]
    r_iota = jax.lax.broadcasted_iota(jnp.int32, (R, N, N), 0)  # hoisted out of loop
    for b in range(B):                                          # B is small & static
        hx_b = hx[b * N:(b + 1) * N]                            # [N, E]
        hy_b = hy[b * N:(b + 1) * N]                            # [N, E]
        hx_r = jnp.broadcast_to(hx_b[None], (R, N, E))
        hy_r = jnp.broadcast_to(hy_b[None], (R, N, E))
        # q[r, j, e] = sum_f W[r, e, f] * hy[j, f]   (batched MXU matmul over r)
        q = jnp.einsum("rjf,ref->rje", hy_r, w, preferred_element_type=f32)
        # s[r, i, j] = sum_e hx[i, e] * q[r, j, e]
        s = jnp.einsum("rie,rje->rij", hx_r, q, preferred_element_type=f32)
        s = s * inv_scale
        s = jnp.where(r_iota == 0, 0.0, s)                      # s_rel[..., 0] = 0
        s_raw_ref[b] = s


# ----------------------------------------------------------------------------
# Parameter construction (deterministic, synthetic) and packing
# ----------------------------------------------------------------------------
def _mlp_params(key, d_in, d_out):
    kw, kb = jax.random.split(key)
    return {"w": jax.random.normal(kw, (d_in, d_out), jnp.float32) * 0.1,
            "b": jax.random.normal(kb, (1, d_out), jnp.float32) * 0.1}


def init_params(key, input_dim, n_mlp_rel, n_rel, rank):
    """Per-submodule parameters, mirroring the PyTorch module layout."""
    counter = [0]

    def nk():
        counter[0] += 1
        return jax.random.fold_in(key, counter[0])

    params = {
        "rel_mlp_x": _mlp_params(nk(), input_dim, n_mlp_rel),
        "rel_mlp_y": _mlp_params(nk(), input_dim, n_mlp_rel),
        "rel_w": jax.random.normal(
            nk(), (n_rel, n_mlp_rel + 1, n_mlp_rel + 1), jnp.float32) * 0.1,
        "label": jax.random.normal(nk(), (n_rel, input_dim), jnp.float32),
    }
    for name in ("sib", "grd", "grd2"):
        p = {}
        for f in ("a", "b", "c", "l1", "l2"):
            p[f"mlp_{f}"] = _mlp_params(nk(), input_dim, n_mlp_rel)
            p[f"proj_{f}"] = jax.random.normal(
                nk(), (n_mlp_rel + 1, rank), jnp.float32) * 0.1
        params[name] = p
    return params


def _block_diag(blocks):
    h, r = blocks[0].shape
    n = len(blocks)
    out = jnp.zeros((n * h, n * r), jnp.float32)
    for i, blk in enumerate(blocks):
        out = out.at[i * h:(i + 1) * h, i * r:(i + 1) * r].set(blk)
    return out


def pack_params(params, n_mlp_rel):
    """Stack all per-factor weights into the fused-kernel layout (done once)."""
    H = n_mlp_rel
    D = params["rel_mlp_x"]["w"].shape[0]
    ones_w = jnp.zeros((D, 1), jnp.float32)   # LeakyReLU(0*x + 1) == 1 -> bias-1 column
    ones_b = jnp.ones((1, 1), jnp.float32)

    w_cols = [params["rel_mlp_x"]["w"], ones_w, params["rel_mlp_y"]["w"], ones_w]
    b_cols = [params["rel_mlp_x"]["b"], ones_b, params["rel_mlp_y"]["b"], ones_b]
    p_blk, pb_cols = [], []
    wl_cols, bl_cols, pl_blk, plb_cols = [], [], [], []
    for name in ("sib", "grd", "grd2"):
        p = params[name]
        for f in ("a", "b", "c"):
            w_cols.append(p[f"mlp_{f}"]["w"])
            b_cols.append(p[f"mlp_{f}"]["b"])
            p_blk.append(p[f"proj_{f}"][:H])        # [H, rank]
            pb_cols.append(p[f"proj_{f}"][H:])      # [1, rank]  (absorbed bias-1 row)
        for f in ("l1", "l2"):
            wl_cols.append(p[f"mlp_{f}"]["w"])
            bl_cols.append(p[f"mlp_{f}"]["b"])
            pl_blk.append(p[f"proj_{f}"][:H])
            plb_cols.append(p[f"proj_{f}"][H:])

    return {
        "label": params["label"],
        "w_rel": params["rel_w"],
        "w_tok": jnp.concatenate(w_cols, axis=1),   # [D, 11H+2]
        "b_tok": jnp.concatenate(b_cols, axis=1),   # [1, 11H+2]
        "p_tok": _block_diag(p_blk),                # [9H, 9*rank]
        "pb_tok": jnp.concatenate(pb_cols, axis=1),  # [1, 9*rank]
        "w_lab": jnp.concatenate(wl_cols, axis=1),  # [D, 6H]
        "b_lab": jnp.concatenate(bl_cols, axis=1),  # [1, 6H]
        "p_lab": _block_diag(pl_blk),               # [6H, 6*rank]
        "pb_lab": jnp.concatenate(plb_cols, axis=1),  # [1, 6*rank]
    }


# ----------------------------------------------------------------------------
# Forward pass (mirrors CPD_SecondOrderDPScorer.forward)
# ----------------------------------------------------------------------------
@functools.partial(jax.jit, static_argnames=("n_mlp_rel", "n_rel", "rank", "scaling"))
def cpd_forward(encoded_emb, packed, *, n_mlp_rel, n_rel, rank, scaling):
    x = encoded_emb[:, :-1]                         # [B, N, D]
    B, N, D = x.shape
    H, R = n_mlp_rel, n_rel
    x_flat = x.reshape(B * N, D)

    kernel = functools.partial(
        _fused_kernel, B=B, N=N, H=H, R=R,
        slope=_LEAKY_SLOPE, inv_scale=1.0 / (float(H) ** scaling))

    s_raw, tok_fac, lab_fac = pl.pallas_call(
        kernel,
        out_shape=(jax.ShapeDtypeStruct((B, R, N, N), jnp.float32),
                   jax.ShapeDtypeStruct((B * N, 9 * rank), jnp.float32),
                   jax.ShapeDtypeStruct((R, 6 * rank), jnp.float32)),
    )(x_flat, packed["label"],
      packed["w_tok"], packed["b_tok"], packed["p_tok"], packed["pb_tok"],
      packed["w_lab"], packed["b_lab"], packed["p_lab"], packed["pb_lab"],
      packed["w_rel"])

    out = {"s_rel": jnp.transpose(s_raw, (0, 2, 3, 1))}    # [B, N, N, R]
    tok = tok_fac.reshape(B, N, 9, rank)
    lab = lab_fac.reshape(R, 6, rank)
    for gi, g in enumerate(("sib", "grd", "grd2")):
        out[f"s_{g}_a"] = tok[:, :, 3 * gi + 0]
        out[f"s_{g}_b"] = tok[:, :, 3 * gi + 1]
        out[f"s_{g}_c"] = tok[:, :, 3 * gi + 2]
        out[f"s_{g}_l1"] = lab[:, 2 * gi + 0]
        out[f"s_{g}_l2"] = lab[:, 2 * gi + 1]
    return out


def cpd_second_order_dp_scorer_forward(ctx, packed, *, n_mlp_rel, n_rel, rank, scaling):
    outs = cpd_forward(ctx["encoded_emb"], packed, n_mlp_rel=n_mlp_rel,
                       n_rel=n_rel, rank=rank, scaling=scaling)
    ctx.update(outs)
    return ctx


# ----------------------------------------------------------------------------
# Pure-JAX reference (unfused math) for correctness checking
# ----------------------------------------------------------------------------
def reference_forward(encoded_emb, params, *, n_mlp_rel, scaling):
    x = encoded_emb[:, :-1]
    B, N, D = x.shape
    xf = x.reshape(B * N, D)

    def mlp(v, p):
        h = v @ p["w"] + p["b"]
        return jnp.where(h >= 0.0, h, _LEAKY_SLOPE * h)

    def aug(h):
        return jnp.concatenate([h, jnp.ones(h.shape[:-1] + (1,), h.dtype)], axis=-1)

    hx = aug(mlp(xf, params["rel_mlp_x"])).reshape(B, N, -1)
    hy = aug(mlp(xf, params["rel_mlp_y"])).reshape(B, N, -1)
    s = jnp.einsum("bie,ref,bjf->bijr", hx, params["rel_w"], hy)
    s = s / (float(n_mlp_rel) ** scaling)
    s = s.at[..., 0].set(0.0)
    out = {"s_rel": s}
    label = params["label"]
    for g in ("sib", "grd", "grd2"):
        p = params[g]
        for f in ("a", "b", "c"):
            out[f"s_{g}_{f}"] = (aug(mlp(xf, p[f"mlp_{f}"])) @ p[f"proj_{f}"]).reshape(B, N, -1)
        for f in ("l1", "l2"):
            out[f"s_{g}_{f}"] = aug(mlp(label, p[f"mlp_{f}"])) @ p[f"proj_{f}"]
    return out


# ----------------------------------------------------------------------------
if __name__ == "__main__":
    B, S, D = 2, 9, 32            # encoded_emb [B, S, D]; x -> [B, 8, D]
    n_mlp_rel, n_rel, rank = 16, 8, 8
    scaling = 0.5

    key = jax.random.PRNGKey(0)
    k_in, k_par = jax.random.split(key)
    encoded_emb = jax.random.normal(k_in, (B, S, D), jnp.float32)
    params = init_params(k_par, D, n_mlp_rel, n_rel, rank)
    packed = pack_params(params, n_mlp_rel)

    ctx = {"encoded_emb": encoded_emb}
    ctx = cpd_second_order_dp_scorer_forward(
        ctx, packed, n_mlp_rel=n_mlp_rel, n_rel=n_rel, rank=rank, scaling=scaling)

    out_keys = (["s_rel"]
                + [f"s_{g}_{f}" for g in ("sib", "grd", "grd2")
                   for f in ("a", "b", "c", "l1", "l2")])
    for k_name in out_keys:
        ctx[k_name].block_until_ready()

    N = S - 1
    assert ctx["s_rel"].shape == (B, N, N, n_rel)
    assert bool(jnp.all(ctx["s_rel"][..., 0] == 0.0))
    assert ctx["s_sib_a"].shape == (B, N, rank)
    assert ctx["s_sib_l1"].shape == (n_rel, rank)

    # numeric check against the unfused pure-JAX reference
    ref = reference_forward(encoded_emb, params, n_mlp_rel=n_mlp_rel, scaling=scaling)
    for k_name in out_keys:
        np.testing.assert_allclose(np.asarray(ctx[k_name]), np.asarray(ref[k_name]),
                                   rtol=2e-2, atol=2e-2)

    print("KERNEL_OK")
</pallas_src>

<mosaic_0001>
module attributes {stable_mosaic.version = 11 : i64} {
  func.func @_fused_kernel(%arg0: memref<16x32xf32, #tpu.memory_space<vmem>>, %arg1: memref<8x32xf32, #tpu.memory_space<vmem>>, %arg2: memref<32x178xf32, #tpu.memory_space<vmem>>, %arg3: memref<1x178xf32, #tpu.memory_space<vmem>>, %arg4: memref<144x72xf32, #tpu.memory_space<vmem>>, %arg5: memref<1x72xf32, #tpu.memory_space<vmem>>, %arg6: memref<32x96xf32, #tpu.memory_space<vmem>>, %arg7: memref<1x96xf32, #tpu.memory_space<vmem>>, %arg8: memref<96x48xf32, #tpu.memory_space<vmem>>, %arg9: memref<1x48xf32, #tpu.memory_space<vmem>>, %arg10: memref<8x17x17xf32, #tpu.memory_space<vmem>>, %arg11: memref<2x8x8x8xf32, #tpu.memory_space<vmem>>, %arg12: memref<16x72xf32, #tpu.memory_space<vmem>>, %arg13: memref<8x48xf32, #tpu.memory_space<vmem>>) attributes {dimension_semantics = [], scalar_prefetch = 0 : i64, scratch_operands = 0 : i64, tpu.core_type = #tpu.core_type<tc>} {
    %c0 = arith.constant 0 : index
    %c0_0 = arith.constant 0 : index
    %0 = vector.load %arg0[%c0, %c0_0] : memref<16x32xf32, #tpu.memory_space<vmem>>, vector<16x32xf32>
    %c0_1 = arith.constant 0 : index
    %c0_2 = arith.constant 0 : index
    %1 = vector.load %arg2[%c0_1, %c0_2] : memref<32x178xf32, #tpu.memory_space<vmem>>, vector<32x178xf32>
    %cst = arith.constant dense<0.000000e+00> : vector<16x178xf32>
    %2 = tpu.matmul %0, %1, %cst {dimension_numbers = #tpu.dot_dimension_numbers<[1], [0], [0], [1], [0, 0, 1, 1], [], []>} : vector<16x32xf32>, vector<32x178xf32>, vector<16x178xf32> -> vector<16x178xf32>
    %c0_3 = arith.constant 0 : index
    %c0_4 = arith.constant 0 : index
    %3 = vector.load %arg3[%c0_3, %c0_4] : memref<1x178xf32, #tpu.memory_space<vmem>>, vector<1x178xf32>
    %4 = vector.broadcast %3 : vector<1x178xf32> to vector<16x178xf32>
    %5 = arith.addf %2, %4 : vector<16x178xf32>
    %cst_5 = arith.constant 0.000000e+00 : f32
    %6 = vector.broadcast %cst_5 : f32 to vector<16x178xf32>
    %7 = arith.cmpf oge, %5, %6 : vector<16x178xf32>
    %cst_6 = arith.constant 0.00999999977 : f32
    %8 = vector.broadcast %cst_6 : f32 to vector<16x178xf32>
    %9 = arith.mulf %8, %5 : vector<16x178xf32>
    %10 = arith.select %7, %5, %9 : vector<16x178xi1>, vector<16x178xf32>
    %11 = vector.extract_strided_slice %10 {offsets = [0, 0], sizes = [16, 17], strides = [1, 1]} : vector<16x178xf32> to vector<16x17xf32>
    %12 = vector.extract_strided_slice %10 {offsets = [0, 17], sizes = [16, 17], strides = [1, 1]} : vector<16x178xf32> to vector<16x17xf32>
    %13 = vector.extract_strided_slice %10 {offsets = [0, 34], sizes = [16, 144], strides = [1, 1]} : vector<16x178xf32> to vector<16x144xf32>
    %c0_7 = arith.constant 0 : index
    %c0_8 = arith.constant 0 : index
    %14 = vector.load %arg4[%c0_7, %c0_8] : memref<144x72xf32, #tpu.memory_space<vmem>>, vector<144x72xf32>
    %cst_9 = arith.constant dense<0.000000e+00> : vector<16x72xf32>
    %15 = tpu.matmul %13, %14, %cst_9 {dimension_numbers = #tpu.dot_dimension_numbers<[1], [0], [0], [1], [0, 0, 1, 1], [], []>} : vector<16x144xf32>, vector<144x72xf32>, vector<16x72xf32> -> vector<16x72xf32>
    %c0_10 = arith.constant 0 : index
    %c0_11 = arith.constant 0 : index
    %16 = vector.load %arg5[%c0_10, %c0_11] : memref<1x72xf32, #tpu.memory_space<vmem>>, vector<1x72xf32>
    %17 = vector.broadcast %16 : vector<1x72xf32> to vector<16x72xf32>
    %18 = arith.addf %15, %17 : vector<16x72xf32>
    %c0_12 = arith.constant 0 : index
    %c0_13 = arith.constant 0 : index
    %19 = vector.load %arg12[%c0_12, %c0_13] : memref<16x72xf32, #tpu.memory_space<vmem>>, vector<16x72xf32>
    tpu.vector_store %arg12[%c0_12, %c0_13], %18 {strides = array<i32>} : memref<16x72xf32, #tpu.memory_space<vmem>>, vector<16x72xf32>,
    %c0_14 = arith.constant 0 : index
    %c0_15 = arith.constant 0 : index
    %20 = vector.load %arg1[%c0_14, %c0_15] : memref<8x32xf32, #tpu.memory_space<vmem>>, vector<8x32xf32>
    %c0_16 = arith.constant 0 : index
    %c0_17 = arith.constant 0 : index
    %21 = vector.load %arg6[%c0_16, %c0_17] : memref<32x96xf32, #tpu.memory_space<vmem>>, vector<32x96xf32>
    %cst_18 = arith.constant dense<0.000000e+00> : vector<8x96xf32>
    %22 = tpu.matmul %20, %21, %cst_18 {dimension_numbers = #tpu.dot_dimension_numbers<[1], [0], [0], [1], [0, 0, 1, 1], [], []>} : vector<8x32xf32>, vector<32x96xf32>, vector<8x96xf32> -> vector<8x96xf32>
    %c0_19 = arith.constant 0 : index
    %c0_20 = arith.constant 0 : index
    %23 = vector.load %arg7[%c0_19, %c0_20] : memref<1x96xf32, #tpu.memory_space<vmem>>, vector<1x96xf32>
    %24 = vector.broadcast %23 : vector<1x96xf32> to vector<8x96xf32>
    %25 = arith.addf %22, %24 : vector<8x96xf32>
    %cst_21 = arith.constant 0.000000e+00 : f32
    %26 = vector.broadcast %cst_21 : f32 to vector<8x96xf32>
    %27 = arith.cmpf oge, %25, %26 : vector<8x96xf32>
    %cst_22 = arith.constant 0.00999999977 : f32
    %28 = vector.broadcast %cst_22 : f32 to vector<8x96xf32>
    %29 = arith.mulf %28, %25 : vector<8x96xf32>
    %30 = arith.select %27, %25, %29 : vector<8x96xi1>, vector<8x96xf32>
    %c0_23 = arith.constant 0 : index
    %c0_24 = arith.constant 0 : index
    %31 = vector.load %arg8[%c0_23, %c0_24] : memref<96x48xf32, #tpu.memory_space<vmem>>, vector<96x48xf32>
    %cst_25 = arith.constant dense<0.000000e+00> : vector<8x48xf32>
    %32 = tpu.matmul %30, %31, %cst_25 {dimension_numbers = #tpu.dot_dimension_numbers<[1], [0], [0], [1], [0, 0, 1, 1], [], []>} : vector<8x96xf32>, vector<96x48xf32>, vector<8x48xf32> -> vector<8x48xf32>
    %c0_26 = arith.constant 0 : index
    %c0_27 = arith.constant 0 : index
    %33 = vector.load %arg9[%c0_26, %c0_27] : memref<1x48xf32, #tpu.memory_space<vmem>>, vector<1x48xf32>
    %34 = vector.broadcast %33 : vector<1x48xf32> to vector<8x48xf32>
    %35 = arith.addf %32, %34 : vector<8x48xf32>
    %c0_28 = arith.constant 0 : index
    %c0_29 = arith.constant 0 : index
    %36 = vector.load %arg13[%c0_28, %c0_29] : memref<8x48xf32, #tpu.memory_space<vmem>>, vector<8x48xf32>
    tpu.vector_store %arg13[%c0_28, %c0_29], %35 {strides = array<i32>} : memref<8x48xf32, #tpu.memory_space<vmem>>, vector<8x48xf32>,
    %c0_30 = arith.constant 0 : index
    %c0_31 = arith.constant 0 : index
    %c0_32 = arith.constant 0 : index
    %37 = vector.load %arg10[%c0_30, %c0_31, %c0_32] : memref<8x17x17xf32, #tpu.memory_space<vmem>>, vector<8x17x17xf32>
    %38 = tpu.iota {dimensions = array<i32: 0>} : vector<8x8x8xi32>
    %39 = vector.extract_strided_slice %11 {offsets = [0, 0], sizes = [8, 17], strides = [1, 1]} : vector<16x17xf32> to vector<8x17xf32>
    %40 = vector.extract_strided_slice %12 {offsets = [0, 0], sizes = [8, 17], strides = [1, 1]} : vector<16x17xf32> to vector<8x17xf32>
    %41 = vector.shape_cast %39 : vector<8x17xf32> to vector<1x8x17xf32>
    %42 = vector.shape_cast %41 : vector<1x8x17xf32> to vector<1x8x17xf32>
    %43 = vector.broadcast %42 : vector<1x8x17xf32> to vector<8x8x17xf32>
    %44 = vector.shape_cast %40 : vector<8x17xf32> to vector<1x8x17xf32>
    %45 = vector.shape_cast %44 : vector<1x8x17xf32> to vector<1x8x17xf32>
    %46 = vector.broadcast %45 : vector<1x8x17xf32> to vector<8x8x17xf32>
    "tpu.trace_start"() <{level = 10 : i32, message = "rjf,ref->rje"}> : () -> ()
    %cst_33 = arith.constant dense<0.000000e+00> : vector<8x8x17xf32>
    %47 = tpu.matmul %46, %37, %cst_33 {dimension_numbers = #tpu.dot_dimension_numbers<[2], [2], [1], [1], [0, 0, 0, 1, 1, 1], [0], [0]>} : vector<8x8x17xf32>, vector<8x17x17xf32>, vector<8x8x17xf32> -> vector<8x8x17xf32>
    "tpu.trace_stop"() : () -> ()
    "tpu.trace_start"() <{level = 10 : i32, message = "rie,rje->rij"}> : () -> ()
    %cst_34 = arith.constant dense<0.000000e+00> : vector<8x8x8xf32>
    %48 = tpu.matmul %43, %47, %cst_34 {dimension_numbers = #tpu.dot_dimension_numbers<[2], [2], [1], [1], [0, 0, 0, 1, 1, 1], [0], [0]>} : vector<8x8x17xf32>, vector<8x8x17xf32>, vector<8x8x8xf32> -> vector<8x8x8xf32>
    "tpu.trace_stop"() : () -> ()
    %cst_35 = arith.constant 2.500000e-01 : f32
    %49 = vector.broadcast %cst_35 : f32 to vector<8x8x8xf32>
    %50 = arith.mulf %48, %49 : vector<8x8x8xf32>
    %c0_i32 = arith.constant 0 : i32
    %51 = vector.broadcast %c0_i32 : i32 to vector<8x8x8xi32>
    %52 = arith.cmpi eq, %38, %51 : vector<8x8x8xi32>
    %cst_36 = arith.constant 0.000000e+00 : f32
    %53 = vector.broadcast %cst_36 : f32 to vector<8x8x8xf32>
    %54 = arith.select %52, %53, %50 : vector<8x8x8xi1>, vector<8x8x8xf32>
    %c0_37 = arith.constant 0 : index
    %c0_38 = arith.constant 0 : index
    %c0_39 = arith.constant 0 : index
    %c0_40 = arith.constant 0 : index
    %55 = vector.load %arg11[%c0_37, %c0_38, %c0_39, %c0_40] : memref<2x8x8x8xf32, #tpu.memory_space<vmem>>, vector<1x8x8x8xf32>
    %56 = vector.shape_cast %55 : vector<1x8x8x8xf32> to vector<8x8x8xf32>
    %57 = vector.shape_cast %54 : vector<8x8x8xf32> to vector<1x8x8x8xf32>
    tpu.vector_store %arg11[%c0_37, %c0_38, %c0_39, %c0_40], %57 {strides = array<i32>} : memref<2x8x8x8xf32, #tpu.memory_space<vmem>>, vector<1x8x8x8xf32>,
    %58 = vector.extract_strided_slice %11 {offsets = [8, 0], sizes = [8, 17], strides = [1, 1]} : vector<16x17xf32> to vector<8x17xf32>
    %59 = vector.extract_strided_slice %12 {offsets = [8, 0], sizes = [8, 17], strides = [1, 1]} : vector<16x17xf32> to vector<8x17xf32>
    %60 = vector.shape_cast %58 : vector<8x17xf32> to vector<1x8x17xf32>
    %61 = vector.shape_cast %60 : vector<1x8x17xf32> to vector<1x8x17xf32>
    %62 = vector.broadcast %61 : vector<1x8x17xf32> to vector<8x8x17xf32>
    %63 = vector.shape_cast %59 : vector<8x17xf32> to vector<1x8x17xf32>
    %64 = vector.shape_cast %63 : vector<1x8x17xf32> to vector<1x8x17xf32>
    %65 = vector.broadcast %64 : vector<1x8x17xf32> to vector<8x8x17xf32>
    "tpu.trace_start"() <{level = 10 : i32, message = "rjf,ref->rje"}> : () -> ()
    %cst_41 = arith.constant dense<0.000000e+00> : vector<8x8x17xf32>
    %66 = tpu.matmul %65, %37, %cst_41 {dimension_numbers = #tpu.dot_dimension_numbers<[2], [2], [1], [1], [0, 0, 0, 1, 1, 1], [0], [0]>} : vector<8x8x17xf32>, vector<8x17x17xf32>, vector<8x8x17xf32> -> vector<8x8x17xf32>
    "tpu.trace_stop"() : () -> ()
    "tpu.trace_start"() <{level = 10 : i32, message = "rie,rje->rij"}> : () -> ()
    %cst_42 = arith.constant dense<0.000000e+00> : vector<8x8x8xf32>
    %67 = tpu.matmul %62, %66, %cst_42 {dimension_numbers = #tpu.dot_dimension_numbers<[2], [2], [1], [1], [0, 0, 0, 1, 1, 1], [0], [0]>} : vector<8x8x17xf32>, vector<8x8x17xf32>, vector<8x8x8xf32> -> vector<8x8x8xf32>
    "tpu.trace_stop"() : () -> ()
    %cst_43 = arith.constant 2.500000e-01 : f32
    %68 = vector.broadcast %cst_43 : f32 to vector<8x8x8xf32>
    %69 = arith.mulf %67, %68 : vector<8x8x8xf32>
    %c0_i32_44 = arith.constant 0 : i32
    %70 = vector.broadcast %c0_i32_44 : i32 to vector<8x8x8xi32>
    %71 = arith.cmpi eq, %38, %70 : vector<8x8x8xi32>
    %cst_45 = arith.constant 0.000000e+00 : f32
    %72 = vector.broadcast %cst_45 : f32 to vector<8x8x8xf32>
    %73 = arith.select %71, %72, %69 : vector<8x8x8xi1>, vector<8x8x8xf32>
    %c1 = arith.constant 1 : index
    %c0_46 = arith.constant 0 : index
    %c0_47 = arith.constant 0 : index
    %c0_48 = arith.constant 0 : index
    %74 = vector.load %arg11[%c1, %c0_46, %c0_47, %c0_48] : memref<2x8x8x8xf32, #tpu.memory_space<vmem>>, vector<1x8x8x8xf32>
    %75 = vector.shape_cast %74 : vector<1x8x8x8xf32> to vector<8x8x8xf32>
    %76 = vector.shape_cast %73 : vector<8x8x8xf32> to vector<1x8x8x8xf32>
    tpu.vector_store %arg11[%c1, %c0_46, %c0_47, %c0_48], %76 {strides = array<i32>} : memref<2x8x8x8xf32, #tpu.memory_space<vmem>>, vector<1x8x8x8xf32>,
    return
  }
}

</mosaic_0001>

<bundles_post_ra>
// kernel: cpd_forward.1
= control target key start
LH: loop header
LB: loop body
LE: loop exit
PB: predicated region body
PF: predicated region fallthrough
CT: control target
= control target key end

     0   :  { %v3543_v3 = vmov 0.0   ;;  %v3544_v4 = vmov 0.0|0.0   ;;  %vm63_vm0 = vcmask 261120   ;;  %vm3545_vm1 = vmmov 0   ;;  %s4252_s2 = inlined_call_operand.vmem [shape: f32[32,178], index: 2, kind: input, shape index: {}]   ;;  %s4253_s6 = inlined_call_operand.vmem [shape: f32[32,96], index: 6, kind: input, shape index: {}]   ;;  %s4254_s0 = inlined_call_operand.vmem [shape: f32[16,32], index: 0, kind: input, shape index: {}]   ;;  %s4255_s1 = inlined_call_operand.vmem [shape: f32[8,32], index: 1, kind: input, shape index: {}]   ;;  %s4256_s4 = inlined_call_operand.vmem [shape: f32[144,72], index: 4, kind: input, shape index: {}]   ;;  %s4257_s8 = inlined_call_operand.vmem [shape: f32[96,48], index: 8, kind: input, shape index: {}]   ;;  %s4258_s3 = inlined_call_operand.vmem [shape: f32[1,178], index: 3, kind: input, shape index: {}]   ;;  %s4259_s7 = inlined_call_operand.vmem [shape: f32[1,96], index: 7, kind: input, shape index: {}]   ;;  %s4260_s10 = inlined_call_operand.vmem [shape: f32[8,17,17], index: 10, kind: input, shape index: {}]   ;;  %s4261_s9 = inlined_call_operand.vmem [shape: f32[1,48], index: 9, kind: input, shape index: {}]   ;;  %s4262_s13 = inlined_call_operand.vmem [shape: f32[8,48], index: 13, kind: output, shape index: {2}]   ;;  %s4263_s5 = inlined_call_operand.vmem [shape: f32[1,72], index: 5, kind: input, shape index: {}]   ;;  %s4264_s12 = inlined_call_operand.vmem [shape: f32[16,72], index: 12, kind: output, shape index: {1}]   ;;  %s4265_s11 = inlined_call_operand.vmem [shape: f32[2,8,8,8], index: 11, kind: output, shape index: {0}]  }
   0x1   :  { %v44_v0 = vld [vmem:[%s4252_s2 + $0x8] sm:$0xff]  ;;  %v46_v1 = vld [vmem:[%s4252_s2 + $0x18] sm:$0xff]  ;;  %v43_v2 = vld [vmem:[%s4252_s2] sm:$0xff]  ;;  %134 = vmatprep.mubr.f32.mxu0 %v3543_v3  ;;  %3423 = vmatprep.subr.bf16.mxu1 %v3544_v4  ;;  %vm493_vm6 = vcmask 138240   ;;  %vm391_vm8 = vcmask 785408   ;;  %vm201_vm10 = vcmask 130048  }
   0x2   :  { %v3415_v5 = vpack.c.bf16 %v46_v1, %v44_v0  ;;  %v45_v6 = vld [vmem:[%s4252_s2 + $0x10] sm:$0xff]  ;;  %v48_v7 = vld [vmem:[%s4252_s2 + $0x28] sm:$0xff]  ;;  %v50_v8 = vld [vmem:[%s4252_s2 + $0x38] sm:$0xff]  ;;  %vm196_vm11 = vcmask 769024   ;;  %vm465_vm12 = vcmask 392192   ;;  %vm281_vm13 = vcmask 588800  }
   0x3   :  { %v3417_v9 = vpack.c.bf16 %v45_v6, %v43_v2  ;;  %v3419_v10 = vpack.c.bf16 %v50_v8, %v48_v7  ;;  %v47_v11 = vld [vmem:[%s4252_s2 + $0x20] sm:$0xff]  ;;  %v49_v12 = vld [vmem:[%s4252_s2 + $0x30] sm:$0xff]  ;;  %v286_v15 = vld [vmem:[%s4253_s6 + $0x8] sm:$0xff]  ;;  %v53_v6 = vlaneseq  ;;  %vm1730_vm14 = vcmask 64512  }
   0x4   :  { %3416 = vmatprep.subr.bf16.mxu0 %v3415_v5  ;;  %v3421_v13 = vpack.c.bf16 %v49_v12, %v47_v11  ;;  %v285_v14 = vld [vmem:[%s4253_s6] sm:$0xff]  ;;  %v287_v18 = vld [vmem:[%s4253_s6 + $0x10] sm:$0xff]  ;;  %v288_v19 = vld [vmem:[%s4253_s6 + $0x18] sm:$0xff]  ;;  %1731 = vst.msk [vmem:[%s4265_s11] sm:$0xff] %vm1730_vm14, %v3543_v3 }
   0x5   :  { %3418 = vmatpush1.bf16.msra.mxu0 %v3417_v9  ;;  %v41_v16 = vld [vmem:[%s4254_s0] sm:$0xff]  ;;  %v3451_v17 = vpack.c.bf16 %v286_v15, %v285_v14  ;;  %v42_v20 = vld [vmem:[%s4254_s0 + $0x8] sm:$0xff]  ;;  %v3454_v21 = vpack.c.bf16 %v288_v19, %v287_v18  ;;  %v161_v28 = vld [vmem:[%s4256_s4 + $0x10] sm:$0xff]  ;;  %v54_v7 = vshrl.u32 %v53_v6, 7  ;;  %3031 = vst.msk [vmem:[%s4265_s11 + $0x40] sm:$0xff] %vm1730_vm14, %v3543_v3 }
   0x6   :  { %3420 = vmatprep.subr.bf16.mxu0 %v3419_v10  ;;  %v284_v22 = vld [vmem:[%s4255_s1] sm:$0xff]  ;;  %v160_v24 = vld [vmem:[%s4256_s4 + $0x8] sm:$0xff]  ;;  %v162_v29 = vld [vmem:[%s4256_s4 + $0x18] sm:$0xff] }
   0x7   :  { %v159_v23 = vld [vmem:[%s4256_s4] sm:$0xff]  ;;  %v373_v27 = vld [vmem:[%s4257_s8 + $0x8] sm:$0xff]  ;;  %v374_v31 = vld [vmem:[%s4257_s8 + $0x10] sm:$0xff]  ;;  %v3427_v33 = vpack.c.bf16 %v162_v29, %v161_v28  ;;  %v55_v8 = vsub.s32 0, %v54_v7  ;;  %v59_v10 = vsub.s32 1, %v54_v7 }
   0x8   :  { %v372_v25 = vld [vmem:[%s4257_s8] sm:$0xff]  ;;  %v3424_v26 = vpack.c.bf16 %v160_v24, %v159_v23  ;;  %v375_v32 = vld [vmem:[%s4257_s8 + $0x18] sm:$0xff]  ;;  %v164_v36 = vld [vmem:[%s4256_s4 + $0x28] sm:$0xff] }
   0x9   :  { %3422 = vmatpush1.bf16.msra.mxu0 %v3421_v13  ;;  %v3457_v30 = vpack.c.bf16 %v373_v27, %v372_v25  ;;  %v3460_v34 = vpack.c.bf16 %v375_v32, %v374_v31  ;;  %v163_v35 = vld [vmem:[%s4256_s4 + $0x20] sm:$0xff]  ;;  %v377_v38 = vld [vmem:[%s4257_s8 + $0x28] sm:$0xff]  ;;  %v165_v41 = vld [vmem:[%s4256_s4 + $0x30] sm:$0xff] }
   0xa   :  { %3450 = vmatprep.subr.bf16.mxu0 %v3544_v4  ;;  %3425 = vmatpush1.bf16.msra.mxu1 %v3424_v26  ;;  %v376_v37 = vld [vmem:[%s4257_s8 + $0x20] sm:$0xff]  ;;  %v3430_v39 = vpack.c.bf16 %v164_v36, %v163_v35  ;;  %v166_v42 = vld [vmem:[%s4256_s4 + $0x38] sm:$0xff]  ;;  %v378_v43 = vld [vmem:[%s4257_s8 + $0x30] sm:$0xff] }
   0xb   :  { %3426 = vmatprep.subr.bf16.mxu1 %v3544_v4  ;;  %v3463_v40 = vpack.c.bf16 %v377_v38, %v376_v37  ;;  %v379_v44 = vld [vmem:[%s4257_s8 + $0x38] sm:$0xff]  ;;  %v3433_v45 = vpack.c.bf16 %v166_v42, %v165_v41  ;;  %v167_v47 = vld [vmem:[%s4256_s4 + $0x40] sm:$0xff]  ;;  %v168_v48 = vld [vmem:[%s4256_s4 + $0x48] sm:$0xff] }
   0xc   :  { %2926 = vmatmul.mubr.msk.f32.vlgmr.msra.gmra.mrb[0].mxu0 %vm63_vm0, %v41_v16  ;;  %v3466_v46 = vpack.c.bf16 %v379_v44, %v378_v43  ;;  %v380_v49 = vld [vmem:[%s4257_s8 + $0x40] sm:$0xff]  ;;  %v381_v50 = vld [vmem:[%s4257_s8 + $0x48] sm:$0xff]  ;;  %v3436_v51 = vpack.c.bf16 %v168_v48, %v167_v47  ;;  %v169_v53 = vld [vmem:[%s4256_s4 + $0x50] sm:$0xff] }
   0xd   :  { %140 = vmatprep.mubr.f32.mxu0 %v3543_v3  ;;  %3452 = vmatpush3.bf16.msra.mxu0 %v3451_v17  ;;  %v3469_v52 = vpack.c.bf16 %v381_v50, %v380_v49  ;;  %v170_v54 = vld [vmem:[%s4256_s4 + $0x58] sm:$0xff]  ;;  %v382_v55 = vld [vmem:[%s4257_s8 + $0x50] sm:$0xff]  ;;  %v171_v59 = vld [vmem:[%s4256_s4 + $0x60] sm:$0xff] }
   0xe   :  { %3453 = vmatprep.subr.bf16.mxu0 %v3544_v4  ;;  %3428 = vmatpush1.bf16.msra.mxu1 %v3427_v33  ;;  %v383_v56 = vld [vmem:[%s4257_s8 + $0x58] sm:$0xff]  ;;  %v3439_v57 = vpack.c.bf16 %v170_v54, %v169_v53  ;;  %v172_v60 = vld [vmem:[%s4256_s4 + $0x68] sm:$0xff]  ;;  %v173_v62 = vld [vmem:[%s4256_s4 + $0x70] sm:$0xff] }
   0xf   :  { %3429 = vmatprep.subr.bf16.mxu1 %v3544_v4  ;;  %v3472_v58 = vpack.c.bf16 %v383_v56, %v382_v55  ;;  %v3442_v61 = vpack.c.bf16 %v172_v60, %v171_v59  ;;  %v174_v63 = vld [vmem:[%s4256_s4 + $0x78] sm:$0xff]  ;;  %v175_v1 = vld [vmem:[%s4256_s4 + $0x80] sm:$0xff]  ;;  %v176_v2 = vld [vmem:[%s4256_s4 + $0x88] sm:$0xff]  ;;  %s3546_s4 = smov 94  }
  0x10   :  { %2927 = vmatmul.mubr.msk.f32.gmra.mrb[2].mxu0 %vm63_vm0, %v42_v20  ;;  %v3445_v0 = vpack.c.bf16 %v174_v63, %v173_v62  ;;  %v3448_v5 = vpack.c.bf16 %v176_v2, %v175_v1  ;;  %v51_v9 = vld [vmem:[%s4258_s3] sm:$0x3]  ;;  %v470_v31 = vld [vmem:[%s4260_s10 + $0x18] sm:$0xff]  ;;  %vm3803_vm9 = vmpackc.low %vm493_vm6, %vm493_vm6 }
  0x11   :  { %3455 = vmatpush3.bf16.msra.mxu0 %v3454_v21  ;;  %3161 = vmatprep.mubr.msk.f32.mxu0 %vm3545_vm1, %v3543_v3  ;;  %v56_v11 = vrot.slane %v51_v9, %v55_v8  ;;  %v60_v12 = vrot.slane %v51_v9, %v59_v10  ;;  %v2931_v24 = vld [vmem:[%s4259_s7] ss:$0 sm:$0xff]  ;;  %s3547_s7 = smov 111   ;;  %v468_v42 = vld [vmem:[%s4260_s10 + $0x8] sm:$0xff]  ;;  %v3858_v53 = vld [vmem:[%s4260_s10 + $0x10] sm:$0x1] }
  0x12   :  { %3456 = vmatprep.subr.bf16.mxu0 %v3544_v4  ;;  %3431 = vmatpush1.bf16.msra.mxu1 %v3430_v39  ;;  %v471_v32 = vld [vmem:[%s4260_s10 + $0x20] sm:$0xff]  ;;  %v3818_v39 = vld [vmem:[%s4260_s10 + $0x28] sm:$0x1]  ;;  %v473_v54 = vld [vmem:[%s4260_s10 + $0x30] sm:$0xff] }
  0x13   :  { %3432 = vmatprep.subr.bf16.mxu1 %v3544_v4  ;;  %v3799_v35 = vpack.c.bf16 %v471_v32, %v470_v31  ;;  %v467_v41 = vld [vmem:[%s4260_s10] sm:$0xff]  ;;  %v476_v44 = vld [vmem:[%s4260_s10 + $0x48] sm:$0xff]  ;;  %v474_v55 = vld [vmem:[%s4260_s10 + $0x38] sm:$0xff] }
  0x14   :  { %3162 = vmatmul.mubr.msk.f32.vlgmr.msra.gmra.mrb[4].mxu0 %vm63_vm0, %v284_v22  ;;  %v3829_v43 = vpack.c.bf16 %v468_v42, %v467_v41  ;;  %v3873_v56 = vld [vmem:[%s4260_s10 + $0x58] sm:$0x1]  ;;  %v483_v59 = vld [vmem:[%s4260_s10 + $0x80] sm:$0xff]  ;;  %v480_v63 = vld [vmem:[%s4260_s10 + $0x68] sm:$0xff] }
  0x15   :  { %3188 = vmatprep.mubr.msk.f32.mxu0 %vm3545_vm1, %v3543_v3  ;;  %3458 = vmatpush3.bf16.msra.mxu0 %v3457_v30  ;;  %v479_v62 = vld [vmem:[%s4260_s10 + $0x60] sm:$0xff]  ;;  %v488_v2 = vld [vmem:[%s4260_s10 + $0xa8] sm:$0xff]  ;;  %v3956_v7 = vld [vmem:[%s4260_s10 + $0x70] sm:$0x1] }
  0x16   :  { %3459 = vmatprep.subr.bf16.mxu0 %v3544_v4  ;;  %3434 = vmatpush1.bf16.msra.mxu1 %v3433_v45  ;;  %v477_v45 = vld [vmem:[%s4260_s10 + $0x50] sm:$0xff]  ;;  %v3923_v1 = vpack.c.bf16 %v480_v63, %v479_v62  ;;  %v486_v9 = vld [vmem:[%s4260_s10 + $0x98] sm:$0xff] }
  0x17   :  { %3435 = vmatprep.subr.bf16.mxu1 %v3544_v4  ;;  %v3838_v49 = vpack.c.bf16 %v477_v45, %v476_v44  ;;  %v485_v8 = vld [vmem:[%s4260_s10 + $0x90] sm:$0xff]  ;;  %v3969_v10 = vld [vmem:[%s4260_s10 + $0xb8] sm:$0x1] }
  0x19   :  { %3461 = vmatpush3.bf16.msra.mxu0 %v3460_v34 }
  0x1a   :  { %3462 = vmatprep.subr.bf16.mxu0 %v3544_v4  ;;  %3437 = vmatpush1.bf16.msra.mxu1 %v3436_v51 }
  0x1b   :  { %3438 = vmatprep.subr.bf16.mxu1 %v3544_v4 }
  0x1d   :  { %3464 = vmatpush3.bf16.msra.mxu0 %v3463_v40 }
  0x1e   :  { %3465 = vmatprep.subr.bf16.mxu0 %v3544_v4  ;;  %3440 = vmatpush1.bf16.msra.mxu1 %v3439_v57  ;;  %v3875_v57 = vpack.c.bf16 %v474_v55, %v473_v54 }
  0x1f   :  { %3441 = vmatprep.subr.bf16.mxu1 %v3544_v4 }
  0x21   :  { %3467 = vmatpush3.bf16.msra.mxu0 %v3466_v46 }
  0x22   :  { %3468 = vmatprep.subr.bf16.mxu0 %v3544_v4  ;;  %3443 = vmatpush1.bf16.msra.mxu1 %v3442_v61  ;;  %v3908_v61 = vld [vmem:[%s4260_s10 + $0x40] sm:$0x1] }
  0x23   :  { %3444 = vmatprep.subr.bf16.mxu1 %v3544_v4 }
  0x25   :  { %3470 = vmatpush3.bf16.msra.mxu0 %v3469_v52 }
  0x26   :  { %3471 = vmatprep.subr.bf16.mxu0 %v3544_v4  ;;  %3446 = vmatpush1.bf16.msra.mxu1 %v3445_v0  ;;  %v3921_v0 = vld [vmem:[%s4260_s10 + $0x88] sm:$0x1] }
  0x27   :  { %3447 = vmatprep.subr.bf16.mxu1 %v3544_v4 }
  0x29   :  { %3473 = vmatpush3.bf16.msra.mxu0 %v3472_v58  ;;  %v482_v58 = vld [vmem:[%s4260_s10 + $0x78] sm:$0xff] }
  0x2a   :  { %3478 = vmatprep.subr.bf16.mxu0 %v3544_v4  ;;  %3449 = vmatpush1.bf16.msra.mxu1 %v3448_v5  ;;  %v3888_v60 = vpack.c.bf16 %v483_v59, %v482_v58  ;;  %v489_v5 = vld [vmem:[%s4260_s10 + $0xb0] sm:$0xff] }
  0x2b   :  { %3474 = vmatprep.subr.bf16.mxu1 %v3544_v4  ;;  %v3936_v6 = vpack.c.bf16 %v489_v5, %v488_v2 }
  0xdf   :  { %v136_v13 = vpop.f32.mrb[0].mxu0 }
  0xe0   :  { %v137_v14 = vadd.f32 %v136_v13, %v56_v11  ;;  %v138_v15 = vpop.f32.mrb[1].mxu0  ;;  %v2933_v13 = vld [vmem:[%s4261_s9] ss:$0 sm:$0xff] }
  0xe1   :  { %v139_v16 = vadd.f32 %v138_v15, %v60_v12 }
  0xe2   :  { %vm147_vm2 = vcmp.ge.f32.partialorder %v137_v14, 0.0  ;;  %v151_v17 = vmul.f32 0.01, %v137_v14 }
  0xe3   :  { %v142_v18 = vpop.f32.mrb[2].mxu0  ;;  %v152_v20 = vmul.f32 0.01, %v139_v16  ;;  %vm148_vm3 = vcmp.ge.f32.partialorder %v139_v16, 0.0 }
  0xe4   :  { %v3784_v19 = vsel %vm147_vm2, %v137_v14, %v151_v17  ;;  %v143_v21 = vadd.f32 %v142_v18, %v56_v11  ;;  %v144_v22 = vpop.f32.mrb[3].mxu0  ;;  %v3971_v11 = vpack.c.bf16 %v486_v9, %v485_v8  ;;  %v2928_v17 = vld [vmem:[%s4263_s5] ss:$0 sm:$0xff] }
  0xe5   :  { %v145_v23 = vadd.f32 %v144_v22, %v60_v12  ;;  %188 = vrot.lane.b32.xlu0 %v3784_v19, %s3546_s4  ;;  %v156_v29 = vsel %vm148_vm3, %v139_v16, %v152_v20  ;;  %v3992_v12 = vld [vmem:[%s4260_s10 + $0xa0] sm:$0x1] }
  0xe6   :  { %vm149_vm4 = vcmp.ge.f32.partialorder %v143_v21, 0.0  ;;  %v153_v25 = vmul.f32 0.01, %v143_v21 }
  0xe7   :  { %v365_v26 = vpop.f32.mrb[4].mxu0  ;;  %v154_v28 = vmul.f32 0.01, %v145_v23  ;;  %vm150_vm5 = vcmp.ge.f32.partialorder %v145_v23, 0.0 }
  0xe8   :  { %v3790_v27 = vsel %vm149_vm4, %v143_v21, %v153_v25  ;;  %v366_v30 = vadd.f32 %v2931_v24, %v365_v26  ;;  %v3163_v33 = vpop.f32.mrb[5].mxu0 }
  0xe9   :  { %192 = vrot.lane.b32.xlu1 %v3790_v27, %s3546_s4  ;;  %190 = vrot.lane.b32.xlu0 %v156_v29, %s3546_s4  ;;  %v158_v36 = vsel %vm150_vm5, %v145_v23, %v154_v28 }
  0xea   :  { %vm369_vm7 = vcmp.ge.f32.partialorder %v366_v30, 0.0  ;;  %v370_v34 = vmul.f32 0.01, %v366_v30 }
  0xec   :  { %v371_v37 = vsel %vm369_vm7, %v366_v30, %v370_v34 }
  0xed   :  { %194 = vrot.lane.b32.xlu1 %v158_v36, %s3546_s4  ;;  %491 = vrot.lane.b32.xlu0 %v3784_v19, %s3547_s7 }
  0xee   :  { %3189 = vmatmul.mubr.msk.f32.vlgmr.msra.gmra.mrb[6].mxu0 %vm391_vm8, %v371_v37 }
  0xef   :  { %3481 = vmatpush3.bf16.xpose.msk.msra.mxu0 %vm3803_vm9, %v3799_v35  ;;  %3206 = vmatprep.mubr.msk.f32.mxu0 %vm3545_vm1, %v3543_v3 }
  0xf0   :  { %3204 = vmatprep.subr.mxu0 %v3543_v3 }
  0xf1   :  { %1739 = vrot.lane.b32.xlu1 %v3790_v27, %s3547_s7 }
  0xf7   :  { %3205 = vmatpush3.xpose.msk.msra.mxu0 %vm493_vm6, %v3818_v39 }
  0xf8   :  { %3486 = vmatprep.subr.bf16.mxu0 %v3544_v4 }
 0x157   :  { %v189_v40 = vpop.permute.xlu0 %188 }
 0x15b   :  { %v193_v46 = vpop.permute.xlu1 %192  ;;  %v191_v47 = vpop.permute.xlu0 %190 }
 0x15c   :  { %2929 = vmatprep.mubr.msk.f32.mxu1 %vm201_vm10, %v191_v47  ;;  %v197_v48 = vsel %vm196_vm11, %v189_v40, %v191_v47 }
 0x15d   :  { %271 = vmatmul.mubr.f32.vlgmr.msra.gmra.mrb[0].mxu1 %v197_v48 }
 0x15e   :  { %3477 = vmatpush3.bf16.xpose.msk.msra.mxu1 %vm3803_vm9, %v3829_v43 }
 0x15f   :  { %v195_v50 = vpop.permute.xlu1 %194  ;;  %v3843_v51 = vpop.permute.xlu0 %491  ;;  %3195 = vmatprep.subr.mxu1 %v3543_v3 }
 0x160   :  { %2930 = vmatprep.mubr.msk.f32.mxu1 %vm201_vm10, %v195_v50  ;;  %3207 = vmatmul.mubr.msk.f32.vlgmr.msra.gmra.mrb[8].mxu0 %vm493_vm6, %v3843_v51  ;;  %v198_v52 = vsel %vm196_vm11, %v193_v46, %v195_v50 }
 0x161   :  { %3489 = vmatpush3.bf16.xpose.msk.msra.mxu0 %vm3803_vm9, %v3838_v49  ;;  %276 = vmatmul.mubr.f32.gmra.mrb[2].mxu1 %v198_v52 }
 0x162   :  { %3197 = vmatprep.mubr.msk.f32.mxu1 %vm3545_vm1, %v3543_v3  ;;  %3222 = vmatprep.subr.mxu0 %v3543_v3 }
 0x163   :  { %3224 = vmatprep.mubr.msk.f32.mxu0 %vm3545_vm1, %v3543_v3 }
 0x166   :  { %3196 = vmatpush3.xpose.msk.msra.mxu1 %vm493_vm6, %v3858_v53 }
 0x167   :  { %3482 = vmatprep.subr.bf16.mxu1 %v3544_v4 }
 0x169   :  { %3198 = vmatmul.mubr.msk.f32.vlgmr.msra.gmra.mrb[4].mxu1 %vm493_vm6, %v3843_v51  ;;  %3223 = vmatpush3.xpose.msk.msra.mxu0 %vm493_vm6, %v3873_v56 }
 0x16a   :  { %3485 = vmatpush3.bf16.xpose.msk.msra.mxu1 %vm3803_vm9, %v3875_v57  ;;  %3494 = vmatprep.subr.bf16.mxu0 %v3544_v4 }
 0x16b   :  { %3213 = vmatprep.subr.mxu1 %v3543_v3  ;;  %3215 = vmatprep.mubr.msk.f32.mxu1 %vm3545_vm1, %v3543_v3 }
 0x16c   :  { %3225 = vmatmul.mubr.msk.f32.vlgmr.msra.gmra.mrb[10].mxu0 %vm493_vm6, %v3843_v51 }
 0x16d   :  { %3497 = vmatpush3.bf16.xpose.msk.msra.mxu0 %vm3803_vm9, %v3888_v60  ;;  %3242 = vmatprep.mubr.msk.f32.mxu0 %vm3545_vm1, %v3543_v3 }
 0x16e   :  { %3240 = vmatprep.subr.mxu0 %v3543_v3 }
 0x172   :  { %3214 = vmatpush3.xpose.msk.msra.mxu1 %vm493_vm6, %v3908_v61 }
 0x173   :  { %3490 = vmatprep.subr.bf16.mxu1 %v3544_v4 }
 0x175   :  { %3216 = vmatmul.mubr.msk.f32.vlgmr.msra.gmra.mrb[6].mxu1 %vm493_vm6, %v3843_v51  ;;  %3241 = vmatpush3.xpose.msk.msra.mxu0 %vm493_vm6, %v3921_v0 }
 0x176   :  { %3493 = vmatpush3.bf16.xpose.msk.msra.mxu1 %vm3803_vm9, %v3923_v1  ;;  %3502 = vmatprep.subr.bf16.mxu0 %v3544_v4 }
 0x177   :  { %3231 = vmatprep.subr.mxu1 %v3543_v3  ;;  %3233 = vmatprep.mubr.msk.f32.mxu1 %vm3545_vm1, %v3543_v3 }
 0x178   :  { %3243 = vmatmul.mubr.msk.f32.vlgmr.msra.gmra.mrb[12].mxu0 %vm493_vm6, %v3843_v51 }
 0x179   :  { %3505 = vmatpush3.bf16.xpose.msk.msra.mxu0 %vm3803_vm9, %v3936_v6  ;;  %3260 = vmatprep.mubr.msk.f32.mxu0 %vm3545_vm1, %v3543_v3 }
 0x17a   :  { %3258 = vmatprep.subr.mxu0 %v3543_v3 }
 0x17e   :  { %3232 = vmatpush3.xpose.msk.msra.mxu1 %vm493_vm6, %v3956_v7 }
 0x17f   :  { %3498 = vmatprep.subr.bf16.mxu1 %v3544_v4 }
 0x181   :  { %3234 = vmatmul.mubr.msk.f32.vlgmr.msra.gmra.mrb[8].mxu1 %vm493_vm6, %v3843_v51  ;;  %3259 = vmatpush3.xpose.msk.msra.mxu0 %vm493_vm6, %v3969_v10 }
 0x182   :  { %3501 = vmatpush3.bf16.xpose.msk.msra.mxu1 %vm3803_vm9, %v3971_v11  ;;  %3251 = vmatprep.mubr.msk.f32.mxu1 %vm3545_vm1, %v3543_v3 }
 0x183   :  { %3249 = vmatprep.subr.mxu1 %v3543_v3  ;;  %3268 = vmatprep.subr.mxu0 %v3543_v3 }
 0x184   :  { %3261 = vmatmul.mubr.msk.f32.vlgmr.msra.gmra.mrb[14].mxu0 %vm493_vm6, %v3843_v51 }
 0x185   :  { %3270 = vmatprep.mubr.msk.f32.mxu0 %vm3545_vm1, %v3543_v3 }
 0x18a   :  { %3250 = vmatpush3.xpose.msk.msra.mxu1 %vm493_vm6, %v3992_v12 }
 0x18b   :  { %3263 = vmatprep.subr.mxu1 %v3543_v3 }
 0x18d   :  { %3252 = vmatmul.mubr.msk.f32.vlgmr.msra.gmra.mrb[10].mxu1 %vm493_vm6, %v3843_v51 }
 0x18e   :  { %3265 = vmatprep.mubr.msk.f32.mxu1 %vm3545_vm1, %v3543_v3 }
 0x1c1   :  { %v461_v14 = vpop.f32.mrb[6].mxu0 }
 0x1c2   :  { %v462_v15 = vadd.f32 %v2933_v13, %v461_v14  ;;  %v3190_v16 = vpop.f32.mrb[7].mxu0 }
 0x1c4   :  { %466 = vst.msk [vmem:[%s4262_s13] sm:$0xff] %vm465_vm12, %v462_v15 }
 0x230   :  { %v272_v18 = vpop.f32.mrb[0].mxu1 }
 0x231   :  { %v273_v20 = vadd.f32 %v2928_v17, %v272_v18  ;;  %v274_v21 = vpop.f32.mrb[1].mxu1 }
 0x233   :  { %282 = vst.msk [vmem:[%s4264_s12] sm:$0xff] %vm281_vm13, %v273_v20  ;;  %v650_v22 = vpop.f32.mrb[8].mxu0 }
 0x234   :  { %v277_v23 = vpop.f32.mrb[2].mxu1  ;;  %v3208_v24 = vpop.f32.mrb[9].mxu0  ;;  %3269 = vmatpush3.xpose.msk.msra.mxu0 %vm493_vm6, %v650_v22 }
 0x235   :  { %v278_v25 = vadd.f32 %v2928_v17, %v277_v23  ;;  %v279_v26 = vpop.f32.mrb[3].mxu1  ;;  %3278 = vmatprep.subr.mxu0 %v3543_v3 }
 0x237   :  { %283 = vst.msk [vmem:[%s4264_s12 + $0x8] sm:$0xff] %vm281_vm13, %v278_v25  ;;  %3271 = vmatmul.mubr.msk.f32.vlgmr.msra.gmra.mrb[16].mxu0 %vm493_vm6, %v3784_v19 }
 0x238   :  { %3280 = vmatprep.mubr.msk.f32.mxu0 %vm3545_vm1, %v3543_v3 }
 0x23c   :  { %v571_v28 = vpop.f32.mrb[4].mxu1 }
 0x23d   :  { %v3199_v29 = vpop.f32.mrb[5].mxu1  ;;  %3264 = vmatpush3.xpose.msk.msra.mxu1 %vm493_vm6, %v571_v28 }
 0x23e   :  { %3273 = vmatprep.subr.mxu1 %v3543_v3 }
 0x23f   :  { %v808_v30 = vpop.f32.mrb[10].mxu0 }
 0x240   :  { %v3226_v31 = vpop.f32.mrb[11].mxu0  ;;  %3266 = vmatmul.mubr.msk.f32.vlgmr.msra.gmra.mrb[12].mxu1 %vm493_vm6, %v3784_v19  ;;  %3279 = vmatpush3.xpose.msk.msra.mxu0 %vm493_vm6, %v808_v30 }
 0x241   :  { %3275 = vmatprep.mubr.msk.f32.mxu1 %vm3545_vm1, %v3543_v3  ;;  %3288 = vmatprep.subr.mxu0 %v3543_v3 }
 0x243   :  { %3281 = vmatmul.mubr.msk.f32.vlgmr.msra.gmra.mrb[18].mxu0 %vm493_vm6, %v3784_v19 }
 0x244   :  { %3290 = vmatprep.mubr.msk.f32.mxu0 %vm3545_vm1, %v3543_v3 }
 0x248   :  { %v729_v32 = vpop.f32.mrb[6].mxu1 }
 0x249   :  { %v3217_v33 = vpop.f32.mrb[7].mxu1  ;;  %3274 = vmatpush3.xpose.msk.msra.mxu1 %vm493_vm6, %v729_v32 }
 0x24a   :  { %3283 = vmatprep.subr.mxu1 %v3543_v3 }
 0x24b   :  { %v966_v34 = vpop.f32.mrb[12].mxu0 }
 0x24c   :  { %v3244_v36 = vpop.f32.mrb[13].mxu0  ;;  %3276 = vmatmul.mubr.msk.f32.vlgmr.msra.gmra.mrb[14].mxu1 %vm493_vm6, %v3784_v19  ;;  %3289 = vmatpush3.xpose.msk.msra.mxu0 %vm493_vm6, %v966_v34 }
 0x24d   :  { %3285 = vmatprep.mubr.msk.f32.mxu1 %vm3545_vm1, %v3543_v3  ;;  %3298 = vmatprep.subr.mxu0 %v3543_v3 }
 0x24f   :  { %3291 = vmatmul.mubr.msk.f32.vlgmr.msra.gmra.mrb[20].mxu0 %vm493_vm6, %v3784_v19 }
 0x250   :  { %3300 = vmatprep.mubr.msk.f32.mxu0 %vm3545_vm1, %v3543_v3 }
 0x254   :  { %v887_v37 = vpop.f32.mrb[8].mxu1 }
 0x255   :  { %v3235_v40 = vpop.f32.mrb[9].mxu1  ;;  %3284 = vmatpush3.xpose.msk.msra.mxu1 %vm493_vm6, %v887_v37 }
 0x256   :  { %3293 = vmatprep.subr.mxu1 %v3543_v3 }
 0x257   :  { %v1124_v41 = vpop.f32.mrb[14].mxu0 }
 0x258   :  { %v3262_v42 = vpop.f32.mrb[15].mxu0  ;;  %3286 = vmatmul.mubr.msk.f32.vlgmr.msra.gmra.mrb[16].mxu1 %vm493_vm6, %v3784_v19  ;;  %3299 = vmatpush3.xpose.msk.msra.mxu0 %vm493_vm6, %v1124_v41 }
 0x259   :  { %3510 = vmatprep.subr.bf16.mxu0 %v3544_v4  ;;  %3295 = vmatprep.mubr.msk.f32.mxu1 %vm3545_vm1, %v3543_v3 }
 0x25b   :  { %3301 = vmatmul.mubr.msk.f32.vlgmr.msra.gmra.mrb[22].mxu0 %vm493_vm6, %v3784_v19 }
 0x25c   :  { %3513 = vmatpush3.bf16.xpose.msk.msra.mxu0 %vm3803_vm9, %v3799_v35  ;;  %3318 = vmatprep.mubr.msk.f32.mxu0 %vm3545_vm1, %v3543_v3  ;;  %v1740_v35 = vpop.permute.xlu1 %1739 }
 0x25d   :  { %3316 = vmatprep.subr.mxu0 %v3543_v3 }
 0x260   :  { %v1045_v44 = vpop.f32.mrb[10].mxu1 }
 0x261   :  { %v3253_v45 = vpop.f32.mrb[11].mxu1  ;;  %3294 = vmatpush3.xpose.msk.msra.mxu1 %vm493_vm6, %v1045_v44 }
 0x262   :  { %3506 = vmatprep.subr.bf16.mxu1 %v3544_v4 }
 0x264   :  { %3296 = vmatmul.mubr.msk.f32.vlgmr.msra.gmra.mrb[18].mxu1 %vm493_vm6, %v3784_v19  ;;  %3317 = vmatpush3.xpose.msk.msra.mxu0 %vm493_vm6, %v3818_v39 }
 0x265   :  { %3509 = vmatpush3.bf16.xpose.msk.msra.mxu1 %vm3803_vm9, %v3829_v43  ;;  %3518 = vmatprep.subr.bf16.mxu0 %v3544_v4 }
 0x266   :  { %3307 = vmatprep.subr.mxu1 %v3543_v3  ;;  %3309 = vmatprep.mubr.msk.f32.mxu1 %vm3545_vm1, %v3543_v3 }
 0x267   :  { %3319 = vmatmul.mubr.msk.f32.vlgmr.msra.gmra.mrb[24].mxu0 %vm493_vm6, %v1740_v35 }
 0x268   :  { %3521 = vmatpush3.bf16.xpose.msk.msra.mxu0 %vm3803_vm9, %v3838_v49  ;;  %3336 = vmatprep.mubr.msk.f32.mxu0 %vm3545_vm1, %v3543_v3 }
 0x269   :  { %3334 = vmatprep.subr.mxu0 %v3543_v3 }
 0x26d   :  { %3308 = vmatpush3.xpose.msk.msra.mxu1 %vm493_vm6, %v3858_v53 }
 0x26e   :  { %3514 = vmatprep.subr.bf16.mxu1 %v3544_v4 }
 0x270   :  { %3310 = vmatmul.mubr.msk.f32.vlgmr.msra.gmra.mrb[20].mxu1 %vm493_vm6, %v1740_v35  ;;  %3335 = vmatpush3.xpose.msk.msra.mxu0 %vm493_vm6, %v3873_v56 }
 0x271   :  { %3517 = vmatpush3.bf16.xpose.msk.msra.mxu1 %vm3803_vm9, %v3875_v57  ;;  %3526 = vmatprep.subr.bf16.mxu0 %v3544_v4 }
 0x272   :  { %3325 = vmatprep.subr.mxu1 %v3543_v3  ;;  %3327 = vmatprep.mubr.msk.f32.mxu1 %vm3545_vm1, %v3543_v3 }
 0x273   :  { %3337 = vmatmul.mubr.msk.f32.vlgmr.msra.gmra.mrb[26].mxu0 %vm493_vm6, %v1740_v35 }
 0x274   :  { %3529 = vmatpush3.bf16.xpose.msk.msra.mxu0 %vm3803_vm9, %v3888_v60  ;;  %3354 = vmatprep.mubr.msk.f32.mxu0 %vm3545_vm1, %v3543_v3 }
 0x275   :  { %3352 = vmatprep.subr.mxu0 %v3543_v3 }
 0x279   :  { %3326 = vmatpush3.xpose.msk.msra.mxu1 %vm493_vm6, %v3908_v61 }
 0x27a   :  { %3522 = vmatprep.subr.bf16.mxu1 %v3544_v4 }
 0x27c   :  { %3328 = vmatmul.mubr.msk.f32.vlgmr.msra.gmra.mrb[22].mxu1 %vm493_vm6, %v1740_v35  ;;  %3353 = vmatpush3.xpose.msk.msra.mxu0 %vm493_vm6, %v3921_v0 }
 0x27d   :  { %3525 = vmatpush3.bf16.xpose.msk.msra.mxu1 %vm3803_vm9, %v3923_v1  ;;  %3534 = vmatprep.subr.bf16.mxu0 %v3544_v4 }
 0x27e   :  { %3343 = vmatprep.subr.mxu1 %v3543_v3  ;;  %3345 = vmatprep.mubr.msk.f32.mxu1 %vm3545_vm1, %v3543_v3 }
 0x27f   :  { %3355 = vmatmul.mubr.msk.f32.vlgmr.msra.gmra.mrb[28].mxu0 %vm493_vm6, %v1740_v35 }
 0x280   :  { %3537 = vmatpush3.bf16.xpose.msk.msra.mxu0 %vm3803_vm9, %v3936_v6  ;;  %3372 = vmatprep.mubr.msk.f32.mxu0 %vm3545_vm1, %v3543_v3 }
 0x281   :  { %3370 = vmatprep.subr.mxu0 %v3543_v3 }
 0x285   :  { %3344 = vmatpush3.xpose.msk.msra.mxu1 %vm493_vm6, %v3956_v7 }
 0x286   :  { %3530 = vmatprep.subr.bf16.mxu1 %v3544_v4 }
 0x288   :  { %3346 = vmatmul.mubr.msk.f32.vlgmr.msra.gmra.mrb[24].mxu1 %vm493_vm6, %v1740_v35  ;;  %3371 = vmatpush3.xpose.msk.msra.mxu0 %vm493_vm6, %v3969_v10 }
 0x289   :  { %3533 = vmatpush3.bf16.xpose.msk.msra.mxu1 %vm3803_vm9, %v3971_v11  ;;  %3363 = vmatprep.mubr.msk.f32.mxu1 %vm3545_vm1, %v3543_v3 }
 0x28a   :  { %3361 = vmatprep.subr.mxu1 %v3543_v3  ;;  %3380 = vmatprep.subr.mxu0 %v3543_v3 }
 0x28b   :  { %3373 = vmatmul.mubr.msk.f32.vlgmr.msra.gmra.mrb[30].mxu0 %vm493_vm6, %v1740_v35 }
 0x28c   :  { %3382 = vmatprep.mubr.msk.f32.mxu0 %vm3545_vm1, %v3543_v3 }
 0x291   :  { %3362 = vmatpush3.xpose.msk.msra.mxu1 %vm493_vm6, %v3992_v12 }
 0x292   :  { %3375 = vmatprep.subr.mxu1 %v3543_v3 }
 0x294   :  { %3364 = vmatmul.mubr.msk.f32.vlgmr.msra.gmra.mrb[26].mxu1 %vm493_vm6, %v1740_v35 }
 0x295   :  { %3377 = vmatprep.mubr.msk.f32.mxu1 %vm3545_vm1, %v3543_v3 }
 0x30a   :  { %v1272_v4 = vpop.f32.mrb[16].mxu0 }
 0x30b   :  { %v1715_v19 = vmul.f32 0.25, %v1272_v4  ;;  %v3272_v38 = vpop.f32.mrb[17].mxu0 }
 0x30d   :  { %1732 = vst.msk [vmem:[%s4265_s11 + $0x8] sm:$0xff] %vm1730_vm14, %v1715_v19 }
 0x313   :  { %v1199_v39 = vpop.f32.mrb[12].mxu1 }
 0x314   :  { %v3267_v43 = vpop.f32.mrb[13].mxu1 }
 0x316   :  { %v1418_v46 = vpop.f32.mrb[18].mxu0 }
 0x317   :  { %v1717_v47 = vmul.f32 0.25, %v1418_v46  ;;  %v3282_v48 = vpop.f32.mrb[19].mxu0 }
 0x319   :  { %1734 = vst.msk [vmem:[%s4265_s11 + $0x18] sm:$0xff] %vm1730_vm14, %v1717_v47 }
 0x31f   :  { %v1345_v49 = vpop.f32.mrb[14].mxu1 }
 0x320   :  { %v1716_v50 = vmul.f32 0.25, %v1345_v49  ;;  %v3277_v51 = vpop.f32.mrb[15].mxu1 }
 0x322   :  { %1733 = vst.msk [vmem:[%s4265_s11 + $0x10] sm:$0xff] %vm1730_vm14, %v1716_v50  ;;  %v1564_v52 = vpop.f32.mrb[20].mxu0 }
 0x323   :  { %v1719_v53 = vmul.f32 0.25, %v1564_v52  ;;  %v3292_v54 = vpop.f32.mrb[21].mxu0 }
 0x325   :  { %1736 = vst.msk [vmem:[%s4265_s11 + $0x28] sm:$0xff] %vm1730_vm14, %v1719_v53 }
 0x32b   :  { %v1491_v55 = vpop.f32.mrb[16].mxu1 }
 0x32c   :  { %v1718_v56 = vmul.f32 0.25, %v1491_v55  ;;  %v3287_v57 = vpop.f32.mrb[17].mxu1 }
 0x32e   :  { %1735 = vst.msk [vmem:[%s4265_s11 + $0x20] sm:$0xff] %vm1730_vm14, %v1718_v56  ;;  %v1710_v58 = vpop.f32.mrb[22].mxu0 }
 0x32f   :  { %v1721_v59 = vmul.f32 0.25, %v1710_v58  ;;  %v3302_v60 = vpop.f32.mrb[23].mxu0 }
 0x331   :  { %1738 = vst.msk [vmem:[%s4265_s11 + $0x38] sm:$0xff] %vm1730_vm14, %v1721_v59 }
 0x337   :  { %v1637_v61 = vpop.f32.mrb[18].mxu1 }
 0x338   :  { %v1720_v62 = vmul.f32 0.25, %v1637_v61  ;;  %v3297_v63 = vpop.f32.mrb[19].mxu1 }
 0x33a   :  { %1737 = vst.msk [vmem:[%s4265_s11 + $0x30] sm:$0xff] %vm1730_vm14, %v1720_v62  ;;  %v1879_v0 = vpop.f32.mrb[24].mxu0 }
 0x33b   :  { %v3320_v1 = vpop.f32.mrb[25].mxu0  ;;  %3381 = vmatpush3.xpose.msk.msra.mxu0 %vm493_vm6, %v1879_v0 }
 0x33c   :  { %3390 = vmatprep.subr.mxu0 %v3543_v3 }
 0x33e   :  { %3383 = vmatmul.mubr.msk.f32.vlgmr.msra.gmra.mrb[32].mxu0 %vm493_vm6, %v3790_v27 }
 0x33f   :  { %3392 = vmatprep.mubr.msk.f32.mxu0 %vm3545_vm1, %v3543_v3 }
 0x343   :  { %v1809_v2 = vpop.f32.mrb[20].mxu1 }
 0x344   :  { %v3311_v5 = vpop.f32.mrb[21].mxu1  ;;  %3376 = vmatpush3.xpose.msk.msra.mxu1 %vm493_vm6, %v1809_v2 }
 0x345   :  { %3385 = vmatprep.subr.mxu1 %v3543_v3 }
 0x346   :  { %v2019_v6 = vpop.f32.mrb[26].mxu0 }
 0x347   :  { %v3338_v7 = vpop.f32.mrb[27].mxu0  ;;  %3378 = vmatmul.mubr.msk.f32.vlgmr.msra.gmra.mrb[28].mxu1 %vm493_vm6, %v3790_v27  ;;  %3391 = vmatpush3.xpose.msk.msra.mxu0 %vm493_vm6, %v2019_v6 }
 0x348   :  { %3387 = vmatprep.mubr.msk.f32.mxu1 %vm3545_vm1, %v3543_v3  ;;  %3400 = vmatprep.subr.mxu0 %v3543_v3 }
 0x34a   :  { %3393 = vmatmul.mubr.msk.f32.vlgmr.msra.gmra.mrb[34].mxu0 %vm493_vm6, %v3790_v27 }
 0x34b   :  { %3402 = vmatprep.mubr.msk.f32.mxu0 %vm3545_vm1, %v3543_v3 }
 0x34f   :  { %v1949_v8 = vpop.f32.mrb[22].mxu1 }
 0x350   :  { %v3329_v9 = vpop.f32.mrb[23].mxu1  ;;  %3386 = vmatpush3.xpose.msk.msra.mxu1 %vm493_vm6, %v1949_v8 }
 0x351   :  { %3395 = vmatprep.subr.mxu1 %v3543_v3 }
 0x352   :  { %v2159_v10 = vpop.f32.mrb[28].mxu0 }
 0x353   :  { %v3356_v11 = vpop.f32.mrb[29].mxu0  ;;  %3388 = vmatmul.mubr.msk.f32.vlgmr.msra.gmra.mrb[30].mxu1 %vm493_vm6, %v3790_v27  ;;  %3401 = vmatpush3.xpose.msk.msra.mxu0 %vm493_vm6, %v2159_v10 }
 0x354   :  { %3397 = vmatprep.mubr.msk.f32.mxu1 %vm3545_vm1, %v3543_v3  ;;  %3410 = vmatprep.subr.mxu0 %v3543_v3 }
 0x356   :  { %3403 = vmatmul.mubr.msk.f32.vlgmr.msra.gmra.mrb[36].mxu0 %vm493_vm6, %v3790_v27 }
 0x357   :  { %3412 = vmatprep.mubr.msk.f32.mxu0 %vm3545_vm1, %v3543_v3 }
 0x35b   :  { %v2089_v12 = vpop.f32.mrb[24].mxu1 }
 0x35c   :  { %v3347_v13 = vpop.f32.mrb[25].mxu1  ;;  %3396 = vmatpush3.xpose.msk.msra.mxu1 %vm493_vm6, %v2089_v12 }
 0x35d   :  { %3405 = vmatprep.subr.mxu1 %v3543_v3 }
 0x35e   :  { %v2299_v14 = vpop.f32.mrb[30].mxu0 }
 0x35f   :  { %v3374_v15 = vpop.f32.mrb[31].mxu0  ;;  %3398 = vmatmul.mubr.msk.f32.vlgmr.msra.gmra.mrb[32].mxu1 %vm493_vm6, %v3790_v27  ;;  %3411 = vmatpush3.xpose.msk.msra.mxu0 %vm493_vm6, %v2299_v14 }
 0x360   :  { %3407 = vmatprep.mubr.msk.f32.mxu1 %vm3545_vm1, %v3543_v3 }
 0x362   :  { %3413 = vmatmul.mubr.msk.f32.vlgmr.msra.gmra.mrb[38].mxu0 %vm493_vm6, %v3790_v27 }
 0x367   :  { %v2229_v16 = vpop.f32.mrb[26].mxu1 }
 0x368   :  { %v3365_v17 = vpop.f32.mrb[27].mxu1  ;;  %3406 = vmatpush3.xpose.msk.msra.mxu1 %vm493_vm6, %v2229_v16 }
 0x36b   :  { %3408 = vmatmul.mubr.msk.f32.vlgmr.msra.gmra.mrb[34].mxu1 %vm493_vm6, %v3790_v27 }
 0x411   :  { %v2447_v18 = vpop.f32.mrb[32].mxu0 }
 0x412   :  { %v2890_v20 = vmul.f32 0.25, %v2447_v18  ;;  %v3384_v21 = vpop.f32.mrb[33].mxu0 }
 0x414   :  { %3032 = vst.msk [vmem:[%s4265_s11 + $0x48] sm:$0xff] %vm1730_vm14, %v2890_v20 }
 0x41a   :  { %v2374_v22 = vpop.f32.mrb[28].mxu1 }
 0x41b   :  { %v3379_v3 = vpop.f32.mrb[29].mxu1 }
 0x41d   :  { %v2593_v23 = vpop.f32.mrb[34].mxu0 }
 0x41e   :  { %v2892_v24 = vmul.f32 0.25, %v2593_v23  ;;  %v3394_v25 = vpop.f32.mrb[35].mxu0 }
 0x420   :  { %3034 = vst.msk [vmem:[%s4265_s11 + $0x58] sm:$0xff] %vm1730_vm14, %v2892_v24 }
 0x426   :  { %v2520_v26 = vpop.f32.mrb[30].mxu1 }
 0x427   :  { %v2891_v27 = vmul.f32 0.25, %v2520_v26  ;;  %v3389_v28 = vpop.f32.mrb[31].mxu1 }
 0x429   :  { %3033 = vst.msk [vmem:[%s4265_s11 + $0x50] sm:$0xff] %vm1730_vm14, %v2891_v27  ;;  %v2739_v29 = vpop.f32.mrb[36].mxu0 }
 0x42a   :  { %v2894_v30 = vmul.f32 0.25, %v2739_v29  ;;  %v3404_v31 = vpop.f32.mrb[37].mxu0 }
 0x42c   :  { %3036 = vst.msk [vmem:[%s4265_s11 + $0x68] sm:$0xff] %vm1730_vm14, %v2894_v30 }
 0x432   :  { %v2666_v32 = vpop.f32.mrb[32].mxu1 }
 0x433   :  { %v2893_v33 = vmul.f32 0.25, %v2666_v32  ;;  %v3399_v34 = vpop.f32.mrb[33].mxu1 }
 0x435   :  { %3035 = vst.msk [vmem:[%s4265_s11 + $0x60] sm:$0xff] %vm1730_vm14, %v2893_v33  ;;  %v2885_v36 = vpop.f32.mrb[38].mxu0 }
 0x436   :  { %v2896_v37 = vmul.f32 0.25, %v2885_v36  ;;  %v3414_v40 = vpop.f32.mrb[39].mxu0 }
 0x438   :  { %3038 = vst.msk [vmem:[%s4265_s11 + $0x78] sm:$0xff] %vm1730_vm14, %v2896_v37 }
 0x43e   :  { %v2812_v41 = vpop.f32.mrb[34].mxu1 }
 0x43f   :  { %v2895_v42 = vmul.f32 0.25, %v2812_v41  ;;  %v3409_v44 = vpop.f32.mrb[35].mxu1 }
 0x441   :  { %3037 = vst.msk [vmem:[%s4265_s11 + $0x70] sm:$0xff] %vm1730_vm14, %v2895_v42 }

</bundles_post_ra>
